<compile_context>
chip_gen: v7x
topology: tpu7x:2x2x1
jax: 0.10.0
libtpu: 0.0.40
codegen_flags: <defaults>
</compile_context>

<pallas_src>
import functools
import math

import jax
import jax.numpy as jnp
from jax.experimental import pallas as pl
from jax.experimental.pallas import tpu as pltpu

_VMEM_LIMIT_BYTES = 48 * 1024 * 1024   # explicit budget; tiles sized well below v7x's 64 MiB
_MASK_VALUE = -1e30                    # finite "-inf" (avoids inf-inf NaNs in online softmax)
_DEFAULT_TILE = 256                    # q / kv / row tile target (multiple of 8, VMEM-friendly)


def _pick_tile(total: int, preferred: int) -> int:
    """Largest tile <= preferred that divides `total` (falls back to `total`)."""
    if total <= preferred:
        return total
    t = preferred
    while t >= 8:
        if total % t == 0:
            return t
        t //= 2
    return total


# ---------------------------------------------------------------------------
# Linear projection kernels (x @ W [+ b]); rows tiled, weights resident.
# ---------------------------------------------------------------------------
def _matmul_kernel(x_ref, w_ref, o_ref):
    o_ref[...] = jnp.dot(x_ref[...], w_ref[...],
                         preferred_element_type=jnp.float32).astype(o_ref.dtype)


def _matmul_bias_kernel(x_ref, w_ref, b_ref, o_ref):
    acc = jnp.dot(x_ref[...], w_ref[...], preferred_element_type=jnp.float32)
    o_ref[...] = (acc + b_ref[...]).astype(o_ref.dtype)


def _linear(x, w_t, bias, out_dtype, row_tile=_DEFAULT_TILE):
    """x: (B, T, K); w_t: (K, N) pre-transposed; bias: (1, N) f32 or None."""
    B, T, K = x.shape
    N = w_t.shape[1]
    tm = _pick_tile(T, row_tile)

    x_spec = pl.BlockSpec((pl.Squeezed(), tm, K), lambda b, i: (b, i, 0))
    w_spec = pl.BlockSpec((K, N), lambda b, i: (0, 0))
    o_spec = pl.BlockSpec((pl.Squeezed(), tm, N), lambda b, i: (b, i, 0))

    if bias is None:
        kernel, in_specs, args = _matmul_kernel, [x_spec, w_spec], (x, w_t)
    else:
        b_spec = pl.BlockSpec((1, N), lambda b, i: (0, 0))
        kernel, in_specs, args = (_matmul_bias_kernel,
                                  [x_spec, w_spec, b_spec], (x, w_t, bias))

    return pl.pallas_call(
        kernel,
        out_shape=jax.ShapeDtypeStruct((B, T, N), out_dtype),
        grid_spec=pltpu.PrefetchScalarGridSpec(
            num_scalar_prefetch=0,
            grid=(B, T // tm),
            in_specs=in_specs,
            out_specs=o_spec),
        compiler_params=pltpu.CompilerParams(
            dimension_semantics=("parallel", "parallel"),
            vmem_limit_bytes=_VMEM_LIMIT_BYTES),
    )(*args)


# ---------------------------------------------------------------------------
# Flash attention (causal, online softmax) over (batch*heads, T, head_dim).
# ---------------------------------------------------------------------------
def _flash_attn_kernel(q_ref, k_ref, v_ref, o_ref, m_sc, l_sc, acc_sc,
                       *, q_tile, kv_tile):
    qi = pl.program_id(1)
    ki = pl.program_id(2)
    nk = pl.num_programs(2)
    q_start = qi * q_tile
    k_start = ki * kv_tile

    @pl.when(ki == 0)
    def _init():
        m_sc[...] = jnp.full_like(m_sc, -jnp.inf)
        l_sc[...] = jnp.zeros_like(l_sc)
        acc_sc[...] = jnp.zeros_like(acc_sc)

    # Skip kv tiles that lie entirely above the causal diagonal.
    @pl.when(k_start <= q_start + (q_tile - 1))
    def _compute():
        q = q_ref[...]                                  # (tq, hd) bf16, pre-scaled by 1/sqrt(hd)
        k = k_ref[...]                                  # (tk, hd) bf16
        v = v_ref[...]                                  # (tk, hd) bf16
        # scores = q @ k.T without an explicit transpose (contract last dims).
        s = jax.lax.dot_general(q, k, (((1,), (1,)), ((), ())),
                                preferred_element_type=jnp.float32)    # (tq, tk)
        row = q_start + jax.lax.broadcasted_iota(jnp.int32, s.shape, 0)
        col = k_start + jax.lax.broadcasted_iota(jnp.int32, s.shape, 1)
        s = jnp.where(col <= row, s, _MASK_VALUE)

        m_prev = m_sc[...]
        m_new = jnp.maximum(m_prev, jnp.max(s, axis=-1, keepdims=True))
        alpha = jnp.exp(m_prev - m_new)
        p = jnp.exp(s - m_new)
        l_sc[...] = alpha * l_sc[...] + jnp.sum(p, axis=-1, keepdims=True)
        acc_sc[...] = alpha * acc_sc[...] + jnp.dot(
            p.astype(v.dtype), v, preferred_element_type=jnp.float32)
        m_sc[...] = m_new

    @pl.when(ki == nk - 1)
    def _finalize():
        # TODO(synk): attention-weight dropout omitted (eval-mode / p=0 identity).
        o_ref[...] = (acc_sc[...] *
                      pl.reciprocal(l_sc[...], approx=True)).astype(o_ref.dtype)


def _flash_attention(q, k, v, *, q_tile=_DEFAULT_TILE, kv_tile=_DEFAULT_TILE):
    """q, k, v: (B*H, T, head_dim) bf16; q already carries the 1/sqrt(hd) scale."""
    BH, T, hd = q.shape
    tq = _pick_tile(T, q_tile)
    tk = _pick_tile(T, kv_tile)

    kernel = functools.partial(_flash_attn_kernel, q_tile=tq, kv_tile=tk)
    return pl.pallas_call(
        kernel,
        out_shape=jax.ShapeDtypeStruct((BH, T, hd), q.dtype),
        grid_spec=pltpu.PrefetchScalarGridSpec(
            num_scalar_prefetch=0,
            grid=(BH, T // tq, T // tk),
            in_specs=[
                pl.BlockSpec((pl.Squeezed(), tq, hd), lambda b, qi, ki: (b, qi, 0)),
                pl.BlockSpec((pl.Squeezed(), tk, hd), lambda b, qi, ki: (b, ki, 0)),
                pl.BlockSpec((pl.Squeezed(), tk, hd), lambda b, qi, ki: (b, ki, 0)),
            ],
            out_specs=pl.BlockSpec((pl.Squeezed(), tq, hd),
                                   lambda b, qi, ki: (b, qi, 0)),
            scratch_shapes=[
                pltpu.VMEM((tq, 1), jnp.float32),    # running max m
                pltpu.VMEM((tq, 1), jnp.float32),    # running denominator l
                pltpu.VMEM((tq, hd), jnp.float32),   # running numerator acc
            ]),
        compiler_params=pltpu.CompilerParams(
            dimension_semantics=("parallel", "parallel", "arbitrary"),
            vmem_limit_bytes=_VMEM_LIMIT_BYTES),
    )(q, k, v)


# ---------------------------------------------------------------------------
# Full module forward.
# ---------------------------------------------------------------------------
def multi_head_attention(x, w_q, w_k, w_v, w_o, b_o, *, num_heads,
                         q_tile=_DEFAULT_TILE, kv_tile=_DEFAULT_TILE,
                         row_tile=_DEFAULT_TILE):
    """Causal MHA forward.

    x: (B, T, d_in) float32.  Weights in PyTorch layout: w_q/w_k/w_v (d_out, d_in),
    w_o (d_out, d_out), b_o (d_out,).  qkv_bias=False; dropout = identity (eval).
    """
    B, T, d_in = x.shape
    d_out = w_q.shape[0]
    assert d_out % num_heads == 0
    hd = d_out // num_heads
    scale = 1.0 / math.sqrt(hd)

    # Fuse QKV weights and fold the softmax scale into W_query (done in f32, free).
    w_qkv_t = jnp.concatenate([w_q.T * scale, w_k.T, w_v.T], axis=1)   # (d_in, 3*d_out)

    compute_dtype = jnp.bfloat16
    xc = x.astype(compute_dtype)
    w_qkv_t = w_qkv_t.astype(compute_dtype)
    w_o_t = w_o.T.astype(compute_dtype)
    b_o2 = b_o.reshape(1, d_out).astype(jnp.float32)

    # 1) fused QKV projection (single lane-dense 3*d_out matmul).
    qkv = _linear(xc, w_qkv_t, bias=None, out_dtype=compute_dtype, row_tile=row_tile)

    # 2) put heads on their own axis (wrapper-side layout plumbing, not in-kernel
    #    lane slicing — head_dim need not be a multiple of 128).
    def to_heads(t):
        return (t.reshape(B, T, num_heads, hd)
                 .transpose(0, 2, 1, 3)
                 .reshape(B * num_heads, T, hd))

    q = to_heads(qkv[:, :, :d_out])
    k = to_heads(qkv[:, :, d_out:2 * d_out])
    v = to_heads(qkv[:, :, 2 * d_out:])

    # 3) causal flash attention with online softmax.
    ctx = _flash_attention(q, k, v, q_tile=q_tile, kv_tile=kv_tile)

    # 4) merge heads and apply the output projection (+ bias).
    ctx = (ctx.reshape(B, num_heads, T, hd)
              .transpose(0, 2, 1, 3)
              .reshape(B, T, d_out))
    return _linear(ctx, w_o_t, bias=b_o2, out_dtype=x.dtype, row_tile=row_tile)


# ---------------------------------------------------------------------------
# Test harness
# ---------------------------------------------------------------------------
def _init_linear(key, fan_in, fan_out):
    """nn.Linear default init: U(-1/sqrt(fan_in), 1/sqrt(fan_in)); weight (fan_out, fan_in)."""
    bound = 1.0 / math.sqrt(fan_in)
    kw, kb = jax.random.split(key)
    w = jax.random.uniform(kw, (fan_out, fan_in), jnp.float32, -bound, bound)
    b = jax.random.uniform(kb, (fan_out,), jnp.float32, -bound, bound)
    return w, b


def _reference(x, wq, wk, wv, wo, bo, num_heads):
    """Pure-JAX f32 reference mirroring the PyTorch forward (dropout = identity)."""
    B, T, d_in = x.shape
    d_out = wq.shape[0]
    hd = d_out // num_heads
    q = (x @ wq.T).reshape(B, T, num_heads, hd).transpose(0, 2, 1, 3)
    k = (x @ wk.T).reshape(B, T, num_heads, hd).transpose(0, 2, 1, 3)
    v = (x @ wv.T).reshape(B, T, num_heads, hd).transpose(0, 2, 1, 3)
    scores = jnp.einsum("bhqd,bhkd->bhqk", q, k)
    mask = jnp.triu(jnp.ones((T, T), bool), k=1)
    scores = jnp.where(mask[None, None], -jnp.inf, scores)
    attn = jax.nn.softmax(scores / math.sqrt(hd), axis=-1)
    ctx = jnp.einsum("bhqk,bhkd->bhqd", attn, v).transpose(0, 2, 1, 3).reshape(B, T, d_out)
    return ctx @ wo.T + bo


if __name__ == "__main__":
    B, T, d_in, d_out, num_heads = 2, 8, 32, 32, 4

    key = jax.random.PRNGKey(0)
    kx, kq, kk, kv, ko = jax.random.split(key, 5)
    x = jax.random.normal(kx, (B, T, d_in), jnp.float32)

    wq, _ = _init_linear(kq, d_in, d_out)   # qkv_bias=False -> biases unused
    wk, _ = _init_linear(kk, d_in, d_out)
    wv, _ = _init_linear(kv, d_in, d_out)
    wo, bo = _init_linear(ko, d_out, d_out)

    mha = jax.jit(functools.partial(multi_head_attention, num_heads=num_heads))
    out = jax.block_until_ready(mha(x, wq, wk, wv, wo, bo))

    ref = _reference(x, wq, wk, wv, wo, bo, num_heads)
    assert out.shape == (B, T, d_out)
    max_err = float(jnp.max(jnp.abs(out - ref)))
    # bf16 matmul inputs (f32 accumulation) -> loosened tolerance vs f32 reference.
    assert jnp.allclose(out, ref, atol=5e-2, rtol=5e-2), \
        f"mismatch vs reference (max abs err {max_err:.4f})"

    print("KERNEL_OK")
</pallas_src>

<mosaic_0001>
module attributes {stable_mosaic.version = 11 : i64} {
  func.func @_matmul_bias_kernel(%arg0: i32, %arg1: i32, %arg2: memref<1x8x32xbf16, #tpu.memory_space<vmem>>, %arg3: memref<32x32xbf16, #tpu.memory_space<vmem>>, %arg4: memref<1x32xf32, #tpu.memory_space<vmem>>, %arg5: memref<1x8x32xf32, #tpu.memory_space<vmem>>) attributes {dimension_semantics = [#tpu.dimension_semantics<parallel>, #tpu.dimension_semantics<parallel>], iteration_bounds = array<i64: 2, 1>, scalar_prefetch = 0 : i64, scratch_operands = 0 : i64, tpu.core_type = #tpu.core_type<tc>, window_params = [{transform_indices = @transform_0, window_bounds = array<i64: 1, 8, 32>}, {pipeline_mode = #tpu.pipeline_mode<synchronous>, transform_indices = @transform_1, window_bounds = array<i64: 32, 32>}, {pipeline_mode = #tpu.pipeline_mode<synchronous>, transform_indices = @transform_2, window_bounds = array<i64: 1, 32>}, {transform_indices = @transform_3, window_bounds = array<i64: 1, 8, 32>}]} {
    %c0 = arith.constant 0 : index
    %c0_0 = arith.constant 0 : index
    %c0_1 = arith.constant 0 : index
    %0 = vector.load %arg2[%c0, %c0_0, %c0_1] : memref<1x8x32xbf16, #tpu.memory_space<vmem>>, vector<1x8x32xbf16>
    %1 = vector.shape_cast %0 : vector<1x8x32xbf16> to vector<8x32xbf16>
    %c0_2 = arith.constant 0 : index
    %c0_3 = arith.constant 0 : index
    %2 = vector.load %arg3[%c0_2, %c0_3] : memref<32x32xbf16, #tpu.memory_space<vmem>>, vector<32x32xbf16>
    %cst = arith.constant dense<0.000000e+00> : vector<8x32xf32>
    %3 = tpu.matmul %1, %2, %cst {dimension_numbers = #tpu.dot_dimension_numbers<[1], [0], [0], [1], [0, 0, 1, 1], [], []>} : vector<8x32xbf16>, vector<32x32xbf16>, vector<8x32xf32> -> vector<8x32xf32>
    %c0_4 = arith.constant 0 : index
    %c0_5 = arith.constant 0 : index
    %4 = vector.load %arg4[%c0_4, %c0_5] : memref<1x32xf32, #tpu.memory_space<vmem>>, vector<1x32xf32>
    %5 = vector.broadcast %4 : vector<1x32xf32> to vector<8x32xf32>
    %6 = arith.addf %3, %5 : vector<8x32xf32>
    %c0_6 = arith.constant 0 : index
    %c0_7 = arith.constant 0 : index
    %c0_8 = arith.constant 0 : index
    %7 = vector.load %arg5[%c0_6, %c0_7, %c0_8] : memref<1x8x32xf32, #tpu.memory_space<vmem>>, vector<1x8x32xf32>
    %8 = vector.shape_cast %7 : vector<1x8x32xf32> to vector<8x32xf32>
    %9 = vector.shape_cast %6 : vector<8x32xf32> to vector<1x8x32xf32>
    tpu.vector_store %arg5[%c0_6, %c0_7, %c0_8], %9 {strides = array<i32>} : memref<1x8x32xf32, #tpu.memory_space<vmem>>, vector<1x8x32xf32>,
    return
  }
  func.func @transform_0(%arg0: i32, %arg1: i32) -> (i32, i32, i32) {
    %c0_i32 = arith.constant 0 : i32
    %c0_i32_0 = arith.constant 0 : i32
    return %arg0, %arg1, %c0_i32 : i32, i32, i32
  }
  func.func @transform_1(%arg0: i32, %arg1: i32) -> (i32, i32) {
    %c0_i32 = arith.constant 0 : i32
    %c0_i32_0 = arith.constant 0 : i32
    %c0_i32_1 = arith.constant 0 : i32
    return %c0_i32, %c0_i32_0 : i32, i32
  }
  func.func @transform_2(%arg0: i32, %arg1: i32) -> (i32, i32) {
    %c0_i32 = arith.constant 0 : i32
    %c0_i32_0 = arith.constant 0 : i32
    %c0_i32_1 = arith.constant 0 : i32
    return %c0_i32, %c0_i32_0 : i32, i32
  }
  func.func @transform_3(%arg0: i32, %arg1: i32) -> (i32, i32, i32) {
    %c0_i32 = arith.constant 0 : i32
    %c0_i32_0 = arith.constant 0 : i32
    return %arg0, %arg1, %c0_i32 : i32, i32, i32
  }
}

module attributes {stable_mosaic.version = 11 : i64} {
  func.func @_matmul_kernel(%arg0: i32, %arg1: i32, %arg2: memref<1x8x32xbf16, #tpu.memory_space<vmem>>, %arg3: memref<32x96xbf16, #tpu.memory_space<vmem>>, %arg4: memref<1x8x96xbf16, #tpu.memory_space<vmem>>) attributes {dimension_semantics = [#tpu.dimension_semantics<parallel>, #tpu.dimension_semantics<parallel>], iteration_bounds = array<i64: 2, 1>, scalar_prefetch = 0 : i64, scratch_operands = 0 : i64, tpu.core_type = #tpu.core_type<tc>, window_params = [{transform_indices = @transform_0, window_bounds = array<i64: 1, 8, 32>}, {pipeline_mode = #tpu.pipeline_mode<synchronous>, transform_indices = @transform_1, window_bounds = array<i64: 32, 96>}, {transform_indices = @transform_2, window_bounds = array<i64: 1, 8, 96>}]} {
    %c0 = arith.constant 0 : index
    %c0_0 = arith.constant 0 : index
    %c0_1 = arith.constant 0 : index
    %0 = vector.load %arg2[%c0, %c0_0, %c0_1] : memref<1x8x32xbf16, #tpu.memory_space<vmem>>, vector<1x8x32xbf16>
    %1 = vector.shape_cast %0 : vector<1x8x32xbf16> to vector<8x32xbf16>
    %c0_2 = arith.constant 0 : index
    %c0_3 = arith.constant 0 : index
    %2 = vector.load %arg3[%c0_2, %c0_3] : memref<32x96xbf16, #tpu.memory_space<vmem>>, vector<32x96xbf16>
    %cst = arith.constant dense<0.000000e+00> : vector<8x96xf32>
    %3 = tpu.matmul %1, %2, %cst {dimension_numbers = #tpu.dot_dimension_numbers<[1], [0], [0], [1], [0, 0, 1, 1], [], []>} : vector<8x32xbf16>, vector<32x96xbf16>, vector<8x96xf32> -> vector<8x96xf32>
    %4 = arith.truncf %3 : vector<8x96xf32> to vector<8x96xbf16>
    %c0_4 = arith.constant 0 : index
    %c0_5 = arith.constant 0 : index
    %c0_6 = arith.constant 0 : index
    %5 = vector.load %arg4[%c0_4, %c0_5, %c0_6] : memref<1x8x96xbf16, #tpu.memory_space<vmem>>, vector<1x8x96xbf16>
    %6 = vector.shape_cast %5 : vector<1x8x96xbf16> to vector<8x96xbf16>
    %7 = vector.shape_cast %4 : vector<8x96xbf16> to vector<1x8x96xbf16>
    tpu.vector_store %arg4[%c0_4, %c0_5, %c0_6], %7 {strides = array<i32>} : memref<1x8x96xbf16, #tpu.memory_space<vmem>>, vector<1x8x96xbf16>,
    return
  }
  func.func @transform_0(%arg0: i32, %arg1: i32) -> (i32, i32, i32) {
    %c0_i32 = arith.constant 0 : i32
    %c0_i32_0 = arith.constant 0 : i32
    return %arg0, %arg1, %c0_i32 : i32, i32, i32
  }
  func.func @transform_1(%arg0: i32, %arg1: i32) -> (i32, i32) {
    %c0_i32 = arith.constant 0 : i32
    %c0_i32_0 = arith.constant 0 : i32
    %c0_i32_1 = arith.constant 0 : i32
    return %c0_i32, %c0_i32_0 : i32, i32
  }
  func.func @transform_2(%arg0: i32, %arg1: i32) -> (i32, i32, i32) {
    %c0_i32 = arith.constant 0 : i32
    %c0_i32_0 = arith.constant 0 : i32
    return %arg0, %arg1, %c0_i32 : i32, i32, i32
  }
}

module attributes {stable_mosaic.version = 11 : i64} {
  func.func @_flash_attn_kernel(%arg0: i32, %arg1: i32, %arg2: i32, %arg3: memref<1x8x8xbf16, #tpu.memory_space<vmem>>, %arg4: memref<1x8x8xbf16, #tpu.memory_space<vmem>>, %arg5: memref<1x8x8xbf16, #tpu.memory_space<vmem>>, %arg6: memref<1x8x8xbf16, #tpu.memory_space<vmem>>, %arg7: memref<8x1xf32, #tpu.memory_space<vmem>>, %arg8: memref<8x1xf32, #tpu.memory_space<vmem>>, %arg9: memref<8x8xf32, #tpu.memory_space<vmem>>) attributes {dimension_semantics = [#tpu.dimension_semantics<parallel>, #tpu.dimension_semantics<parallel>, #tpu.dimension_semantics<arbitrary>], iteration_bounds = array<i64: 8, 1, 1>, scalar_prefetch = 0 : i64, scratch_operands = 3 : i64, tpu.core_type = #tpu.core_type<tc>, window_params = [{transform_indices = @transform_0, window_bounds = array<i64: 1, 8, 8>}, {transform_indices = @transform_1, window_bounds = array<i64: 1, 8, 8>}, {transform_indices = @transform_2, window_bounds = array<i64: 1, 8, 8>}, {transform_indices = @transform_3, window_bounds = array<i64: 1, 8, 8>}]} {
    %c8_i32 = arith.constant 8 : i32
    %0 = arith.muli %arg1, %c8_i32 : i32
    %c8_i32_0 = arith.constant 8 : i32
    %1 = arith.muli %arg2, %c8_i32_0 : i32
    %c0_i32 = arith.constant 0 : i32
    %2 = arith.cmpi eq, %arg2, %c0_i32 : i32
    %3 = arith.extui %2 : i1 to i32
    %c0_i32_1 = arith.constant 0 : i32
    %4 = arith.cmpi ne, %3, %c0_i32_1 : i32
    scf.if %4 {
      %cst = arith.constant 0xFF800000 : f32
      %12 = vector.broadcast %cst : f32 to vector<8x1xf32>
      %c0 = arith.constant 0 : index
      %c0_5 = arith.constant 0 : index
      %13 = vector.load %arg7[%c0, %c0_5] : memref<8x1xf32, #tpu.memory_space<vmem>>, vector<8x1xf32>
      tpu.vector_store %arg7[%c0, %c0_5], %12 {strides = array<i32>} : memref<8x1xf32, #tpu.memory_space<vmem>>, vector<8x1xf32>,
      %cst_6 = arith.constant 0.000000e+00 : f32
      %14 = vector.broadcast %cst_6 : f32 to vector<8x1xf32>
      %c0_7 = arith.constant 0 : index
      %c0_8 = arith.constant 0 : index
      %15 = vector.load %arg8[%c0_7, %c0_8] : memref<8x1xf32, #tpu.memory_space<vmem>>, vector<8x1xf32>
      tpu.vector_store %arg8[%c0_7, %c0_8], %14 {strides = array<i32>} : memref<8x1xf32, #tpu.memory_space<vmem>>, vector<8x1xf32>,
      %cst_9 = arith.constant 0.000000e+00 : f32
      %16 = vector.broadcast %cst_9 : f32 to vector<8x8xf32>
      %c0_10 = arith.constant 0 : index
      %c0_11 = arith.constant 0 : index
      %17 = vector.load %arg9[%c0_10, %c0_11] : memref<8x8xf32, #tpu.memory_space<vmem>>, vector<8x8xf32>
      tpu.vector_store %arg9[%c0_10, %c0_11], %16 {strides = array<i32>} : memref<8x8xf32, #tpu.memory_space<vmem>>, vector<8x8xf32>,
    } else {
    }
    %c7_i32 = arith.constant 7 : i32
    %5 = arith.addi %0, %c7_i32 : i32
    %6 = arith.cmpi sle, %1, %5 : i32
    %7 = arith.extui %6 : i1 to i32
    %c0_i32_2 = arith.constant 0 : i32
    %8 = arith.cmpi ne, %7, %c0_i32_2 : i32
    scf.if %8 {
      %c0 = arith.constant 0 : index
      %c0_5 = arith.constant 0 : index
      %c0_6 = arith.constant 0 : index
      %12 = vector.load %arg3[%c0, %c0_5, %c0_6] : memref<1x8x8xbf16, #tpu.memory_space<vmem>>, vector<1x8x8xbf16>
      %13 = vector.shape_cast %12 : vector<1x8x8xbf16> to vector<8x8xbf16>
      %c0_7 = arith.constant 0 : index
      %c0_8 = arith.constant 0 : index
      %c0_9 = arith.constant 0 : index
      %14 = vector.load %arg4[%c0_7, %c0_8, %c0_9] : memref<1x8x8xbf16, #tpu.memory_space<vmem>>, vector<1x8x8xbf16>
      %15 = vector.shape_cast %14 : vector<1x8x8xbf16> to vector<8x8xbf16>
      %c0_10 = arith.constant 0 : index
      %c0_11 = arith.constant 0 : index
      %c0_12 = arith.constant 0 : index
      %16 = vector.load %arg5[%c0_10, %c0_11, %c0_12] : memref<1x8x8xbf16, #tpu.memory_space<vmem>>, vector<1x8x8xbf16>
      %17 = vector.shape_cast %16 : vector<1x8x8xbf16> to vector<8x8xbf16>
      %cst = arith.constant dense<0.000000e+00> : vector<8x8xf32>
      %18 = tpu.matmul %13, %15, %cst {dimension_numbers = #tpu.dot_dimension_numbers<[1], [1], [0], [0], [0, 0, 1, 0], [], []>} : vector<8x8xbf16>, vector<8x8xbf16>, vector<8x8xf32> -> vector<8x8xf32>
      %19 = tpu.iota {dimensions = array<i32: 0>} : vector<8x8xi32>
      %20 = vector.broadcast %0 : i32 to vector<8x8xi32>
      %21 = arith.addi %20, %19 : vector<8x8xi32>
      %22 = tpu.iota {dimensions = array<i32: 1>} : vector<8x8xi32>
      %23 = vector.broadcast %1 : i32 to vector<8x8xi32>
      %24 = arith.addi %23, %22 : vector<8x8xi32>
      %25 = arith.cmpi sle, %24, %21 : vector<8x8xi32>
      %cst_13 = arith.constant -1.000000e+30 : f32
      %26 = vector.broadcast %cst_13 : f32 to vector<8x8xf32>
      %27 = arith.select %25, %18, %26 : vector<8x8xi1>, vector<8x8xf32>
      %c0_14 = arith.constant 0 : index
      %c0_15 = arith.constant 0 : index
      %28 = vector.load %arg7[%c0_14, %c0_15] : memref<8x1xf32, #tpu.memory_space<vmem>>, vector<8x1xf32>
      %cst_16 = arith.constant dense<0xFF800000> : vector<8xf32>
      %29 = vector.multi_reduction <maximumf>, %27, %cst_16 [1] : vector<8x8xf32> to vector<8xf32>
      %30 = vector.shape_cast %29 : vector<8xf32> to vector<8x1xf32>
      %31 = arith.maximumf %28, %30 : vector<8x1xf32>
      %32 = arith.subf %28, %31 : vector<8x1xf32>
      %33 = math.exp %32 : vector<8x1xf32>
      %34 = vector.broadcast %31 : vector<8x1xf32> to vector<8x8xf32>
      %35 = arith.subf %27, %34 : vector<8x8xf32>
      %36 = math.exp %35 : vector<8x8xf32>
      %c0_17 = arith.constant 0 : index
      %c0_18 = arith.constant 0 : index
      %37 = vector.load %arg8[%c0_17, %c0_18] : memref<8x1xf32, #tpu.memory_space<vmem>>, vector<8x1xf32>
      %38 = arith.mulf %33, %37 : vector<8x1xf32>
      %cst_19 = arith.constant dense<0.000000e+00> : vector<8xf32>
      %39 = vector.multi_reduction <add>, %36, %cst_19 [1] : vector<8x8xf32> to vector<8xf32>
      %40 = vector.shape_cast %39 : vector<8xf32> to vector<8x1xf32>
      %41 = arith.addf %38, %40 : vector<8x1xf32>
      %c0_20 = arith.constant 0 : index
      %c0_21 = arith.constant 0 : index
      %42 = vector.load %arg8[%c0_20, %c0_21] : memref<8x1xf32, #tpu.memory_space<vmem>>, vector<8x1xf32>
      tpu.vector_store %arg8[%c0_20, %c0_21], %41 {strides = array<i32>} : memref<8x1xf32, #tpu.memory_space<vmem>>, vector<8x1xf32>,
      %c0_22 = arith.constant 0 : index
      %c0_23 = arith.constant 0 : index
      %43 = vector.load %arg9[%c0_22, %c0_23] : memref<8x8xf32, #tpu.memory_space<vmem>>, vector<8x8xf32>
      %44 = vector.broadcast %33 : vector<8x1xf32> to vector<8x8xf32>
      %45 = arith.mulf %44, %43 : vector<8x8xf32>
      %46 = arith.truncf %36 : vector<8x8xf32> to vector<8x8xbf16>
      %cst_24 = arith.constant dense<0.000000e+00> : vector<8x8xf32>
      %47 = tpu.matmul %46, %17, %cst_24 {dimension_numbers = #tpu.dot_dimension_numbers<[1], [0], [0], [1], [0, 0, 1, 1], [], []>} : vector<8x8xbf16>, vector<8x8xbf16>, vector<8x8xf32> -> vector<8x8xf32>
      %48 = arith.addf %45, %47 : vector<8x8xf32>
      %c0_25 = arith.constant 0 : index
      %c0_26 = arith.constant 0 : index
      %49 = vector.load %arg9[%c0_25, %c0_26] : memref<8x8xf32, #tpu.memory_space<vmem>>, vector<8x8xf32>
      tpu.vector_store %arg9[%c0_25, %c0_26], %48 {strides = array<i32>} : memref<8x8xf32, #tpu.memory_space<vmem>>, vector<8x8xf32>,
      %c0_27 = arith.constant 0 : index
      %c0_28 = arith.constant 0 : index
      %50 = vector.load %arg7[%c0_27, %c0_28] : memref<8x1xf32, #tpu.memory_space<vmem>>, vector<8x1xf32>
      tpu.vector_store %arg7[%c0_27, %c0_28], %31 {strides = array<i32>} : memref<8x1xf32, #tpu.memory_space<vmem>>, vector<8x1xf32>,
    } else {
    }
    %c0_i32_3 = arith.constant 0 : i32
    %9 = arith.cmpi eq, %arg2, %c0_i32_3 : i32
    %10 = arith.extui %9 : i1 to i32
    %c0_i32_4 = arith.constant 0 : i32
    %11 = arith.cmpi ne, %10, %c0_i32_4 : i32
    scf.if %11 {
      %c0 = arith.constant 0 : index
      %c0_5 = arith.constant 0 : index
      %12 = vector.load %arg9[%c0, %c0_5] : memref<8x8xf32, #tpu.memory_space<vmem>>, vector<8x8xf32>
      %c0_6 = arith.constant 0 : index
      %c0_7 = arith.constant 0 : index
      %13 = vector.load %arg8[%c0_6, %c0_7] : memref<8x1xf32, #tpu.memory_space<vmem>>, vector<8x1xf32>
      %14 = tpu.reciprocal %13 {approx = true} : vector<8x1xf32> -> vector<8x1xf32>
      %15 = vector.broadcast %14 : vector<8x1xf32> to vector<8x8xf32>
      %16 = arith.mulf %12, %15 : vector<8x8xf32>
      %17 = arith.truncf %16 : vector<8x8xf32> to vector<8x8xbf16>
      %c0_8 = arith.constant 0 : index
      %c0_9 = arith.constant 0 : index
      %c0_10 = arith.constant 0 : index
      %18 = vector.load %arg6[%c0_8, %c0_9, %c0_10] : memref<1x8x8xbf16, #tpu.memory_space<vmem>>, vector<1x8x8xbf16>
      %19 = vector.shape_cast %18 : vector<1x8x8xbf16> to vector<8x8xbf16>
      %20 = vector.shape_cast %17 : vector<8x8xbf16> to vector<1x8x8xbf16>
      tpu.vector_store %arg6[%c0_8, %c0_9, %c0_10], %20 {strides = array<i32>} : memref<1x8x8xbf16, #tpu.memory_space<vmem>>, vector<1x8x8xbf16>,
    } else {
    }
    return
  }
  func.func @transform_0(%arg0: i32, %arg1: i32, %arg2: i32) -> (i32, i32, i32) {
    %c0_i32 = arith.constant 0 : i32
    %c0_i32_0 = arith.constant 0 : i32
    return %arg0, %arg1, %c0_i32 : i32, i32, i32
  }
  func.func @transform_1(%arg0: i32, %arg1: i32, %arg2: i32) -> (i32, i32, i32) {
    %c0_i32 = arith.constant 0 : i32
    %c0_i32_0 = arith.constant 0 : i32
    return %arg0, %arg2, %c0_i32 : i32, i32, i32
  }
  func.func @transform_2(%arg0: i32, %arg1: i32, %arg2: i32) -> (i32, i32, i32) {
    %c0_i32 = arith.constant 0 : i32
    %c0_i32_0 = arith.constant 0 : i32
    return %arg0, %arg2, %c0_i32 : i32, i32, i32
  }
  func.func @transform_3(%arg0: i32, %arg1: i32, %arg2: i32) -> (i32, i32, i32) {
    %c0_i32 = arith.constant 0 : i32
    %c0_i32_0 = arith.constant 0 : i32
    return %arg0, %arg1, %c0_i32 : i32, i32, i32
  }
}

</mosaic_0001>

<bundles_post_ra>
// kernel: multi_head_attention.3
= control target key start
LH: loop header
LB: loop body
LE: loop exit
PB: predicated region body
PF: predicated region fallthrough
CT: control target
= control target key end

     0   :  { %s401_s9 = smov 0   ;;  %s403_s10 = smov 0   ;;  %s440_s0 = inlined_call_operand.vmem [shape: bf16[2,8,32], index: 0, kind: input, shape index: {}]   ;;  %s441_s1 = inlined_call_operand.vmem [shape: bf16[32,96], index: 1, kind: input, shape index: {}]   ;;  %s442_s2 = inlined_call_operand.vmem [shape: bf16[2,8,96], index: 2, kind: output, shape index: {}]  }
   0x1   :  { %s405_s11 = smov 0  }
   0x2 LB: > { %s24_s12 = sadd.s32 1, %s378_s10  ;;  %p313_p0 = scmp.ge.s32.totalorder %s382_s11, 1  ;;  %s382_s11 = sphi %s405_s11, %s12_s11   ;;  %s378_s10 = sphi %s403_s10, %s444_s10   ;;  %s374_s9 = sphi %s401_s9, %s443_s9  }
   0x3   : > { %p26_p1 = scmp.ge.s32.totalorder %s24_s12, 2  ;;  %p130_p2 = scmp.lt.s32.totalorder %s382_s11, 3 }
   0x5   : > { %s446_s12 = smov (%p26_p1, %s24_s12), 0  ;;  %p131_p3 = pnand %p313_p0, %p130_p2 }
   0x6   : > { %v358_v0 = vld [vmem:[%s441_s1] sm:$0xff] (!%p131_p3)   ;;  %v384_v1 = vmov (!%p131_p3), 0.0   ;;  %v359_v2 = vld [vmem:[%s441_s1 + $0x8] sm:$0xff] (!%p131_p3)   ;;  %vm385_vm0 = vmmov (!%p131_p3), 0   ;;  %p156_p4 = scmp.lt.s32.totalorder (!%p131_p3), %s374_s9, 1  ;;  %vm188_vm1 = vcmask (!%p131_p3), 261120  }
   0x7   : > { %134 = sbr.rel (%p131_p3) target bundleno = 233 (0xe9), region = 28  ;;  %324 = vmatprep.subr.bf16.mxu0 (!%p131_p3), %v384_v1  ;;  %328 = vmatprep.mubr.msk.bf16.mxu0 (!%p131_p3), %vm385_vm0, %v384_v1  ;;  %vm233_vm2 = vcmask (!%p131_p3), 781312  }
   0x8   : > { %325 = vmatpush3.bf16.msra.mxu0 (!%p131_p3), %v358_v0 }
   0x9   : > { %326 = vmatprep.subr.bf16.mxu0 (!%p131_p3), %v384_v1 }
   0xc   : > { %327 = vmatpush3.bf16.msra.mxu0 (!%p131_p3), %v359_v2 }
   0xe   : > { %s448_s9 = smov (!%p156_p4, %s374_s9), 1 }
   0xf   : > { %s314_s17 = sshll.u32 %s448_s9, 2 }
  0x10   : > { %s162_s20 = scalar_lea.vmem %s440_s0, %s314_s17  ;;  %s169_s23 = scalar_lea.vmem %s442_s2, %s314_s17 }
  0x11   : > { %v171_v3 = vld [vmem:[%s162_s20] sm:$0xf] }
  0x12   : > { %329 = vmatmul.mubr.msk.bf16.vlgmr.msra.gmra.mrb[0].mxu0 %vm188_vm1, %v171_v3 }
  0xe5   : > { %v226_v4 = vpop.f32.mrb[0].mxu0 }
  0xe6   : > { %v232_v5 = vpack.c.bf16 %v226_v4, %v226_v4  ;;  %v330_v6 = vpop.f32.mrb[1].mxu0 }
  0xe7   : > { %v229_v7 = vpop.f32.mrb[2].mxu0 }
  0xe8   : > { %234 = vst.msk [vmem:[%s169_s23] sm:$0xf] %vm233_vm2, %v232_v5  ;;  %v331_v8 = vpop.f32.mrb[3].mxu0 }
  0xe9 PF: > { %s12_s11 = sadd.s32 1, %s382_s11   ;;  %s443_s9 = smov %s378_s10 }
  0xea   : > { %p9_p5 = scmp.ge.s32.totalorder %s12_s11, 4   ;;  %s444_s10 = smov %s446_s12 }
  0xec   :  { %11 = sbr.rel (!%p9_p5) target bundleno = 2 (0x2), region = 58 }

// kernel: multi_head_attention.5
= control target key start
LH: loop header
LB: loop body
LE: loop exit
PB: predicated region body
PF: predicated region fallthrough
CT: control target
= control target key end

     0   :  { %8 = vsyncpa [#allocation3], 0  ;;  %s658_s0 = inlined_call_operand.vmem [shape: bf16[2,8,32], index: 0, kind: input, shape index: {}]   ;;  %s659_s1 = inlined_call_operand.vmem [shape: bf16[32,32], index: 1, kind: input, shape index: {}]   ;;  %s660_s2 = inlined_call_operand.vmem [shape: f32[1,32], index: 2, kind: input, shape index: {}]   ;;  %s661_s3 = inlined_call_operand.hbm [shape: f32[2,8,32], index: 3, kind: output, shape index: {}]  }
   0x1   :  { %10 = vsyncpa [#allocation3 + $0x1], 0  ;;  %s535_s12 = smov 0   ;;  %s537_s13 = smov 0  }
   0x2   :  { %s539_s14 = smov 0   ;;  %s541_s15 = smov 0  }
   0x3   :  { %s543_s16 = smov 0   ;;  %s545_s17 = smov 0  }
   0x4 LB: > { %s347_s18 = sadd.s32 4294967295, %s510_s17   ;;  %s348_s19 = sadd.s32 4294967294, %s510_s17   ;;  %s510_s17 = sphi %s545_s17, %s16_s17   ;;  %s506_s16 = sphi %s543_s16, %s668_s16   ;;  %s502_s15 = sphi %s541_s15, %s667_s15   ;;  %s498_s14 = sphi %s539_s14, %s666_s14   ;;  %s494_s13 = sphi %s537_s13, %s665_s13   ;;  %s490_s12 = sphi %s535_s12, %s664_s12  }
   0x5   : > { %s28_s20 = sadd.s32 1, %s506_s16  ;;  %s107_s21 = sadd.s32 1, %s498_s14 }
   0x6   : > { %p30_p0 = scmp.ge.s32.totalorder %s28_s20, 2  ;;  %p117_p1 = scmp.ne.s32.totalorder %s498_s14, %s494_s13 }
   0x7   : > { %p118_p2 = scmp.eq.s32.totalorder %s347_s18, 1  ;;  %p123_p3 = scmp.ne.s32.totalorder %s494_s13, %s490_s12 }
   0x8   : > { %s670_s20 = smov (%p30_p0, %s28_s20), 0  ;;  %p124_p5 = scmp.eq.s32.totalorder %s348_s19, 1 }
   0x9   : > { %p575_p4 = por %p118_p2, %p117_p1  ;;  %s102_s23 = ssub.s32 %s506_s16, %s670_s20 }
   0xa   : > { %p351_p6 = scmp.ge.s32.totalorder %s510_s17, 1  ;;  %p105_p7 = scmp.eq.s32.totalorder %s102_s23, 0 }
   0xb   : > { %p582_p8 = por %p124_p5, %p123_p3  ;;  %p158_p9 = scmp.lt.s32.totalorder %s510_s17, 3 }
   0xc   : > { %s588_s25 = scalar_select %p105_p7, %s498_s14, %s107_s21  }
   0xd   : > { %p159_p10 = pnand %p351_p6, %p158_p9 }
   0xe   : > { %v430_v0 = vld [vmem:[%s659_s1] sm:$0xff] (!%p159_p10)   ;;  %v512_v1 = vmov (!%p159_p10), 0.0   ;;  %v431_v2 = vld [vmem:[%s659_s1 + $0x8] sm:$0xff] (!%p159_p10)   ;;  %vm513_vm0 = vmmov (!%p159_p10), 0   ;;  %p184_p11 = scmp.lt.s32.totalorder (!%p159_p10), %s502_s15, 1  ;;  %vm216_vm1 = vcmask (!%p159_p10), 261120  }
   0xf   : > { %162 = sbr.rel (%p159_p10) target bundleno = 255 (0xff), region = 32  ;;  %365 = vmatprep.subr.bf16.mxu0 (!%p159_p10), %v512_v1  ;;  %369 = vmatprep.mubr.msk.bf16.mxu0 (!%p159_p10), %vm513_vm0, %v512_v1  ;;  %s181_s8 = sand.u32 (!%p159_p10), 1, %s494_s13   ;;  %v354_v4 = vld [vmem:[%s660_s2] ss:$0 sm:$0xff] (!%p159_p10) }
  0x10   : > { %366 = vmatpush3.bf16.msra.mxu0 (!%p159_p10), %v430_v0  ;;  %s352_s9 = sshll.u32 (!%p159_p10), %s181_s8, 3  ;;  %s359_s18 = sshll.u32 (!%p159_p10), %s502_s15, 7 }
  0x11   : > { %367 = vmatprep.subr.bf16.mxu0 (!%p159_p10), %v512_v1  ;;  %s183_s19 = scalar_lea.vmem (!%p159_p10), [#allocation2], %s352_s9  ;;  %s610_s27 = scalar_lea.hbm (!%p159_p10), %s661_s3, %s359_s18 }
  0x12   : > { %s276_s21 = sshll.u32 (!%p159_p10), %s183_s19, 4  ;;  %s514_s29 = smov (!%p159_p10), [#allocation2]   ;;  %s612_s21 = int_to_ptr.vmem [resolvable:$true] %s276_s21 }
  0x13   : > { %s432_s28 = scalar_lea.vmem (!%p159_p10), %s612_s21, 128 }
  0x14   : > { %368 = vmatpush3.bf16.msra.mxu0 (!%p159_p10), %v431_v2  ;;  %p433_p12 = scmp.ne.s32.totalorder (!%p159_p10), %s612_s21, %s432_s28 }
  0x16   : > { %s185_s30 = scalar_select %p184_p11, %s502_s15, 1 }
  0x17   : > { %s262_s15 = scalar_lea.sflag [#allocation3], %s181_s8  ;;  %p434_p13 = pnand %p433_p12, %p575_p4 }
  0x18   : > { %s353_s4 = sshll.u32 %s185_s30, 2  ;;  %s436_s30 = sshll.u32 %s514_s29, 4  ;;  %s437_s30 = int_to_ptr.vmem [resolvable:$false] %s436_s30 }
  0x19   : > { %s190_s7 = scalar_lea.vmem %s658_s0, %s353_s4  ;;  %p435_p0 = pneg %p434_p13 }
  0x1a   : > { %v192_v3 = vld [vmem:[%s190_s7] sm:$0xf]  ;;  %s438_s4 = scalar_lea.vmem %s437_s30, 256  ;;  %p439_p1 = scmp.lt.s32.totalorder %s612_s21, %s437_s30 }
  0x1b   : > { %370 = vmatmul.mubr.msk.bf16.vlgmr.msra.gmra.mrb[0].mxu0 %vm216_vm1, %v192_v3  ;;  %p440_p2 = scmp.lt.s32.totalorder %s438_s4, %s432_s28 }
  0x1d   : > { %p441_p3 = por %p440_p2, %p439_p1 }
  0x1f   : > { %p442_p5 = pnand %p441_p3, %p435_p0 }
  0xee   : > { %v254_v5 = vpop.f32.mrb[0].mxu0 }
  0xef   : > { %v255_v6 = vadd.f32 %v354_v4, %v254_v5  ;;  %v371_v7 = vpop.f32.mrb[1].mxu0 }
  0xf0   : > { %v257_v8 = vpop.f32.mrb[2].mxu0 }
  0xf1   : > { %v372_v9 = vpop.f32.mrb[3].mxu0  ;;  %260 = vst.msk [vmem:[%s183_s19] sm:$0xff] %vm216_vm1, %v255_v6 }
  0xf2   : > { %445 = shalt.err (!%p442_p5)
}
  0xf3   : > { %s446_s5 = scalar_lea.hbm %s610_s27, 128  ;;  %s450_s8 = scalar_lea.hbm %s661_s3, 256 }
  0xf4   : > { %p447_p6 = scmp.ne.s32.totalorder %s610_s27, %s446_s5  ;;  %p451_p10 = scmp.lt.u32.totalorder %s610_s27, %s661_s3 }
  0xf5   : > { %p452_p11 = scmp.lt.u32.totalorder %s450_s8, %s446_s5  ;;  %p454_p13 = scmp.lt.u32.totalorder %s446_s5, %s610_s27 }
  0xf6   : > { %p448_p7 = pnand %p447_p6, %p575_p4 }
  0xf7   : > { %p453_p12 = por %p452_p11, %p451_p10 }
  0xf8   : > { %p449_p9 = pneg %p448_p7 }
  0xf9   : > { %p455_p0 = por %p454_p13, %p453_p12 }
  0xfb   : > { %p456_p1 = pnand %p455_p0, %p449_p9 }
  0xfd   : > { %459 = shalt.err (!%p456_p1)
}
  0xfe   : > { %373 = dma.vmem_to_hbm [thread:$0]  (%p575_p4), %s612_s21, 128, %s610_s27, %s262_s15  }
  0xff PF: > { %p379_p2 = scmp.ge.s32.totalorder %s510_s17, 2  ;;  %s288_s11 = sand.u32 1, %s490_s12  }
 0x100   : > { %s289_s18 = scalar_lea.sflag [#allocation3], %s288_s11 }
 0x101   : > { %p376_p3 = pnand %p379_p2, %p582_p8 }
 0x103   : > { %485 = dma.done.wait (!%p376_p3), %s289_s18, 128  }
 0x104   : > { %487 = vsyncadd (!%p376_p3), %s289_s18, 4294967168  ;;  %s16_s17 = sadd.s32 1, %s510_s17   ;;  %s664_s12 = smov %s494_s13 }
 0x105   : > { %p13_p5 = scmp.ge.s32.totalorder %s16_s17, 4   ;;  %s665_s13 = smov %s498_s14 }
 0x106   : > { %s666_s14 = smov %s588_s25  ;;  %s667_s15 = smov %s506_s16 }
 0x107   : > { %s668_s16 = smov %s670_s20  ;;  %15 = sbr.rel (!%p13_p5) target bundleno = 4 (0x4), region = 67 }
 0x10e   :  { %294 = vsyncpa [#allocation3], 1 }
 0x10f   :  { %296 = vsyncpa [#allocation3 + $0x1], 1 }

// kernel: multi_head_attention.4
= control target key start
LH: loop header
LB: loop body
LE: loop exit
PB: predicated region body
PF: predicated region fallthrough
CT: control target
= control target key end

     0   :  { %s654_s12 = smov 0   ;;  %s656_s13 = smov 0   ;;  %s710_s0 = inlined_call_operand.vmem [shape: bf16[8,8,8], index: 0, kind: input, shape index: {}]   ;;  %s711_s1 = inlined_call_operand.vmem [shape: bf16[8,8,8], index: 1, kind: input, shape index: {}]   ;;  %s712_s2 = inlined_call_operand.vmem [shape: bf16[8,8,8], index: 2, kind: input, shape index: {}]   ;;  %s713_s3 = inlined_call_operand.vmem [shape: bf16[8,8,8], index: 3, kind: output, shape index: {}]  }
   0x1   :  { %s658_s14 = smov 0  }
   0x2 LB: > { %s32_s15 = sadd.s32 1, %s624_s13  ;;  %p545_p0 = scmp.ge.s32.totalorder %s628_s14, 1  ;;  %s628_s14 = sphi %s658_s14, %s13_s14   ;;  %s624_s13 = sphi %s656_s13, %s715_s13   ;;  %s620_s12 = sphi %s654_s12, %s714_s12  }
   0x3   : > { %p34_p1 = scmp.ge.s32.totalorder %s32_s15, 8  ;;  %p190_p2 = scmp.lt.s32.totalorder %s628_s14, 9 }
   0x5   : > { %s717_s15 = smov (%p34_p1, %s32_s15), 0  ;;  %p191_p3 = pnand %p545_p0, %p190_p2 }
   0x6   : > { %p232_p4 = scmp.lt.s32.totalorder (!%p191_p3), %s620_s12, 7  ;;  %vm270_vm0 = vcmask (!%p191_p3), 64512   ;;  %v630_v0 = vmov (!%p191_p3), 0.0   ;;  %vm631_vm1 = vmmov (!%p191_p3), 0   ;;  %vm267_vm2 = vcmask (!%p191_p3), 7168  }
   0x7   : > { %194 = sbr.rel (%p191_p3) target bundleno = 824 (0x338), region = 32  ;;  %558 = vmatprep.subr.bf16.mxu0 (!%p191_p3), %v630_v0  ;;  %271 = vst.msk [vmem:[#allocation4] sm:$0xff] (!%p191_p3), %vm270_vm0, %v630_v0  ;;  %560 = vmatprep.mubr.msk.bf16.mxu0 (!%p191_p3), %vm631_vm1, %v630_v0  ;;  %v632_v4 = vmov (!%p191_p3), -inf   ;;  %v327_v5 = vlaneseq (!%p191_p3)  ;;  %v633_v14 = vmov (!%p191_p3), 0   ;;  %vm372_vm4 = vcmask (!%p191_p3), 1043456  }
   0x8   : > { %564 = vmatprep.subr.bf16.mxu1 (!%p191_p3), %v630_v0  ;;  %566 = vmatprep.mubr.msk.bf16.mxu1 (!%p191_p3), %vm631_vm1, %v630_v0  ;;  %268 = vst.msk [vmem:[#allocation2] sm:$0xff] (!%p191_p3), %vm267_vm2, %v632_v4  ;;  %269 = vst.msk [vmem:[#allocation3] sm:$0xff] (!%p191_p3), %vm267_vm2, %v630_v0  ;;  %vm432_vm5 = vcmask (!%p191_p3), 60416  }
   0x9   : > { %v328_v6 = vshrl.u32 (!%p191_p3), %v327_v5, 7  ;;  %v332_v7 = vand.u32 (!%p191_p3), 127, %v327_v5  ;;  %598 = vset.pattern.permute.xlu0 (!%p191_p3), %v633_v14  ;;  %599 = vset.pattern.permute.xlu1 (!%p191_p3), %v633_v14 }
   0xb   : > { %vm335_vm3 = vcmp.le.s32.totalorder (!%p191_p3), %v332_v7, %v328_v6 }
   0xe   : > { %s719_s12 = smov (!%p232_p4, %s620_s12), 7  ;;  %v361_v35 = vld [vmem:[#allocation4] sm:$0xff] }
   0xf   : > { %s673_s16 = sshll.u32 %s719_s12, 2  ;;  %v337_v15 = vld [vmem:[#allocation2] sm:$0xff]  ;;  %v353_v29 = vld [vmem:[#allocation3] sm:$0xff] }
  0x10   : > { %s245_s19 = scalar_lea.vmem %s711_s1, %s673_s16  ;;  %s238_s22 = scalar_lea.vmem %s710_s0, %s673_s16 }
  0x11   : > { %v278_v1 = vld [vmem:[%s245_s19] sm:$0xf]  ;;  %s252_s25 = scalar_lea.vmem %s712_s2, %s673_s16  ;;  %s259_s28 = scalar_lea.vmem %s713_s3, %s673_s16 }
  0x12   : > { %v285_v2 = vsel %vm270_vm0, %v278_v1, 0  ;;  %v277_v3 = vld [vmem:[%s238_s22] sm:$0xf] }
  0x13   : > { %559 = vmatpush3.bf16.xpose.msra.mxu0 %v285_v2  ;;  %v279_v19 = vld [vmem:[%s252_s25] sm:$0xf] }
  0x14   : > { %v374_v20 = vsel %vm372_vm4, %v279_v19, 0 }
  0x15   : > { %565 = vmatpush3.bf16.msra.mxu1 %v374_v20 }
  0x1a   : > { %561 = vmatmul.mubr.msk.bf16.vlgmr.msra.gmra.mrb[0].mxu0 %vm270_vm0, %v277_v3 }
  0xed   : > { %v321_v8 = vpop.f32.mrb[0].mxu0 }
  0xee   : > { %v336_v9 = vsel %vm335_vm3, %v321_v8, -1e+30  ;;  %v562_v10 = vpop.f32.mrb[1].mxu0 }
  0xef   : > { %v324_v11 = vpop.f32.mrb[2].mxu0  ;;  %v338_v12 = vsel %vm270_vm0, %v336_v9, -inf }
  0xf0   : > { %339 = vmax.xlane.f32.xlu0 %v338_v12  ;;  %v563_v13 = vpop.f32.mrb[3].mxu0 }
 0x17d   : > { %v340_v16 = vpop.xlane.xlu0 %339 }
 0x17e   : > { %v341_v17 = vmax.f32 %v337_v15, %v340_v16 }
 0x180   : > { %v342_v18 = vsub.f32 %v337_v15, %v341_v17  ;;  %418 = vst.msk [vmem:[#allocation2] sm:$0xff] %vm267_vm2, %v341_v17  ;;  %347 = vperm.xlu0 %598, %v341_v17  }
 0x182   : > { %v343_v27 = vmul.f32 1.442695, %v342_v18 }
 0x1ff   : > { %v348_v21 = vpop.permute.xlu0 %347 }
 0x200   : > { %v350_v22 = vsub.f32 %v336_v9, %v348_v21 }
 0x202   : > { %v351_v23 = vmul.f32 1.442695, %v350_v22 }
 0x204   : > { %600 = vpow2.f32 %v351_v23 }
 0x205   : > { %602 = vpow2.f32 %v343_v27 }
 0x20e   : > { %v601_v24 = vpop.eup %600 }
 0x20f   : > { %v355_v25 = vsel %vm270_vm0, %v601_v24, 0.0  ;;  %v368_v26 = vpack.c.bf16 %v601_v24, %v601_v24  ;;  %v603_v28 = vpop.eup %602 }
 0x210   : > { %356 = vadd.xlane.f32.xlu1 %v355_v25  ;;  %v354_v30 = vmul.f32 %v603_v28, %v353_v29 }
 0x211   : > { %567 = vmatmul.mubr.msk.bf16.vlgmr.msra.gmra.mrb[0].mxu1 %vm270_vm0, %v368_v26 }
 0x221   : > { %364 = vperm.xlu1 %599, %v603_v28  }
 0x29d   : > { %v357_v31 = vpop.xlane.xlu1 %356 }
 0x29e   : > { %v358_v32 = vadd.f32 %v357_v31, %v354_v30 }
 0x2a0   : > { %360 = vst.msk [vmem:[#allocation3] sm:$0xff] %vm267_vm2, %v358_v32 }
 0x2a1   : > { %v365_v36 = vpop.permute.xlu1 %364 }
 0x2a2   : > { %v367_v37 = vmul.f32 %v365_v36, %v361_v35 }
 0x2a7   : > { %v423_v33 = vld [vmem:[#allocation3] sm:$0xff] }
 0x2a8   : > { %604 = vrcp.f32 %v423_v33 }
 0x2b2   : > { %v605_v34 = vpop.eup %604 }
 0x2b3   : > { %427 = vperm.xlu1 %599, %v605_v34  }
 0x2e4   : > { %v410_v38 = vpop.f32.mrb[0].mxu1 }
 0x2e5   : > { %v416_v39 = vadd.f32 %v410_v38, %v367_v37  ;;  %v568_v40 = vpop.f32.mrb[1].mxu1 }
 0x2e6   : > { %v413_v41 = vpop.f32.mrb[2].mxu1 }
 0x2e7   : > { %417 = vst.msk [vmem:[#allocation4] sm:$0xff] %vm270_vm0, %v416_v39  ;;  %v569_v42 = vpop.f32.mrb[3].mxu1 }
 0x2ee   : > { %v422_v43 = vld [vmem:[#allocation4] sm:$0xff] }
 0x332   : > { %v428_v44 = vpop.permute.xlu1 %427 }
 0x333   : > { %v430_v45 = vmul.f32 %v428_v44, %v422_v43 }
 0x335   : > { %v431_v46 = vpack.c.bf16 %v430_v45, %v430_v45 }
 0x337   : > { %433 = vst.msk [vmem:[%s259_s28] sm:$0xf] %vm432_vm5, %v431_v46 }
 0x338 PF: > { %s13_s14 = sadd.s32 1, %s628_s14   ;;  %s714_s12 = smov %s624_s13 }
 0x339   : > { %p10_p5 = scmp.ge.s32.totalorder %s13_s14, 10   ;;  %s715_s13 = smov %s717_s15 }
 0x33b   :  { %12 = sbr.rel (!%p10_p5) target bundleno = 2 (0x2), region = 80 }

</bundles_post_ra>
